<compile_context>
chip_gen: v7x
topology: tpu7x:2x2x1
jax: 0.10.0
libtpu: 0.0.40
codegen_flags: <defaults>
</compile_context>

<pallas_src>
import jax
import jax.numpy as jnp
from jax.experimental import pallas as pl
from jax.experimental.pallas import tpu as pltpu


_USER_TARGET_BLOCK_BYTES = 16 * 1024 * 1024  # upper bound on per-step output block
_MIN_GRID_STEPS = 4                          # >= 2 tiles per TensorCore (v7x megacore)


def _vmem_budget_bytes():
    """~75% of per-core VMEM (headroom for Mosaic scratch / semaphores).

    Falls back to the most constrained generation (v7x: 64 MiB/TC) if the
    hardware query is unavailable.
    """
    cap = 64 * 1024 * 1024
    try:
        info = pltpu.get_tpu_info()
        cap = int(getattr(info, "vmem_capacity_bytes", cap)) or cap
    except Exception:
        pass
    return (3 * cap) // 4


def _aligned_divisors(n, align):
    """Ascending divisors of n that are multiples of `align`; [n] if none."""
    if n % align != 0:
        return [n]
    return [d for d in range(align, n + 1, align) if n % d == 0]


def _sublane_options(batch, itemsize):
    """Legal batch-tile sizes, preferring the dtype-native packed tile height."""
    native = max(8, 32 // itemsize)          # 8 for f32, 16 for bf16, 32 for int8/fp8
    opts = _aligned_divisors(batch, native)
    if batch % native != 0 and batch % 8 == 0:
        opts = _aligned_divisors(batch, 8)   # still legal, just sub-native height
    return opts


def _choose_tiles(batch, flat, itemsize, target_bytes):
    """Pick (batch_tile, lane_tile) for the (batch, seq_len*d_model) output.

    Tiles always satisfy the TPU BlockSpec constraint (sublane dim a multiple
    of 8 or the full dim; lane dim a multiple of 128 or the full dim), target
    ~`target_bytes` of output per grid step, never exceed it when a smaller
    legal tile exists (hardened unaligned fallback), and keep the grid large
    enough to feed both v7x TensorCores.
    """
    bt_opts = _sublane_options(batch, itemsize)
    ft_opts = _aligned_divisors(flat, 128)   # [flat] if flat % 128 != 0

    bt = bt_opts[0]
    ft = ft_opts[0]
    # Largest lane tile that keeps the smallest legal batch tile in budget.
    for cand in ft_opts:
        if bt * cand * itemsize <= target_bytes:
            ft = cand
    # Grow the batch tile with whatever budget remains.
    for cand in bt_opts:
        if cand * ft * itemsize <= target_bytes:
            bt = cand
    # Unaligned fallback (flat % 128 != 0 -> ft == flat): clamp bt back to the
    # smallest legal option so the block cannot balloon past the budget and
    # blow the (v7x-first) VMEM limit at compile time.
    if bt * ft * itemsize > target_bytes:
        bt = bt_opts[0]

    # Megacore: ensure enough grid steps for 2 TensorCores.  Shrink the lane
    # tile first (keeps per-flat-chunk table reuse across the batch axis),
    # then the batch tile.
    def _steps(bt_, ft_):
        return (flat // ft_) * (batch // bt_)

    fi = ft_opts.index(ft)
    while _steps(bt, ft) < _MIN_GRID_STEPS and fi > 0:
        fi -= 1
        ft = ft_opts[fi]
    bi = bt_opts.index(bt)
    while _steps(bt, ft) < _MIN_GRID_STEPS and bi > 0:
        bi -= 1
        bt = bt_opts[bi]
    return bt, ft


def _bcast_kernel(emb_ref, out_ref):
    # emb_ref: (1, ft)  lane-dense chunk of the flattened positional table.
    # out_ref: (bt, ft) output block -> sublane-broadcast the single table row.
    # The broadcast is free filler while the output DMA dominates; folding it
    # into a stride-0 sublane-broadcast load is the follow-up micro-opt once
    # the x-add fusion puts real VALU work in this loop.
    out_ref[...] = jnp.broadcast_to(emb_ref[...], out_ref.shape)


def learned_positional_encoder(x, pos_table):
    """JAX/Pallas equivalent of LearnedPositionalEncoder.forward.

    Args:
      x: [batch, seq_len, d_model] -- only its shape is used (matches PyTorch).
      pos_table: [max_len, d_model] learned embedding table.
    Returns:
      [batch, seq_len, d_model] positional embeddings (dtype of pos_table).
    """
    batch, seq_len, d_model = x.shape
    max_len, table_d = pos_table.shape
    assert d_model == table_d, "d_model mismatch"
    assert seq_len <= max_len, "seq_len exceeds max_len"

    flat = seq_len * d_model
    itemsize = jnp.dtype(pos_table.dtype).itemsize

    # Hoist the row gather out of the kernel and flatten (S, D) -> (1, S*D):
    # one resident, lane-dense table slab (no per-step re-slicing, no masked
    # partial stores when d_model < 128).
    emb_flat = pos_table[:seq_len].reshape(1, flat)

    vmem_budget = _vmem_budget_bytes()                 # ~48 MiB v7x, ~96 MiB v5e/v6e
    target_block_bytes = min(_USER_TARGET_BLOCK_BYTES, vmem_budget // 8)

    bt, ft = _choose_tiles(batch, flat, itemsize, target_block_bytes)
    grid = (flat // ft, batch // bt)  # exact cover: tiles are divisors

    # Double-buffered output block + table block with 2x headroom, floored
    # above the v5e 16 MiB scoped default and capped at ~75% of physical VMEM
    # (leaves Mosaic room for internal scratch on v7x's 64 MiB per-TC VMEM).
    block_bytes = (bt * ft + ft) * itemsize
    vmem_limit = int(min(vmem_budget, max(16 * 1024 * 1024, 4 * block_bytes)))

    out2d = pl.pallas_call(
        _bcast_kernel,
        out_shape=jax.ShapeDtypeStruct((batch, flat), pos_table.dtype),
        grid_spec=pltpu.PrefetchScalarGridSpec(
            num_scalar_prefetch=0,
            grid=grid,
            in_specs=[
                # Table tile depends only on the outer (flat) grid axis, so it
                # is DMA'd once per flat tile and reused across batch tiles.
                pl.BlockSpec((1, ft), lambda f, b: (0, f)),
            ],
            out_specs=pl.BlockSpec((bt, ft), lambda f, b: (b, f)),
        ),
        compiler_params=pltpu.CompilerParams(
            dimension_semantics=("parallel", "parallel"),
            vmem_limit_bytes=vmem_limit,
        ),
    )(emb_flat)

    return out2d.reshape(batch, seq_len, d_model)


if __name__ == "__main__":
    key = jax.random.PRNGKey(0)
    k_x, k_emb, k_x2, k_emb2 = jax.random.split(key, 4)

    # Small shapes consistent with the module's forward: [batch, seq, d_model].
    batch, seq_len, d_model, max_len = 2, 8, 32, 64
    x = jax.random.normal(k_x, (batch, seq_len, d_model), dtype=jnp.float32)
    # Deterministic stand-in for the nn.Embedding(max_len, d_model) weight.
    pos_table = jax.random.normal(k_emb, (max_len, d_model), dtype=jnp.float32)

    out = jax.block_until_ready(learned_positional_encoder(x, pos_table))
    ref = jnp.broadcast_to(pos_table[:seq_len][None], (batch, seq_len, d_model))
    assert out.shape == (batch, seq_len, d_model)
    assert bool(jnp.array_equal(out, ref))

    # Exercise the hardened unaligned fallback: flat = seq*d_model % 128 != 0.
    b2, s2, d2, m2 = 2, 8, 24, 64
    x2 = jax.random.normal(k_x2, (b2, s2, d2), dtype=jnp.float32)
    tbl2 = jax.random.normal(k_emb2, (m2, d2), dtype=jnp.float32)
    out2 = jax.block_until_ready(learned_positional_encoder(x2, tbl2))
    ref2 = jnp.broadcast_to(tbl2[:s2][None], (b2, s2, d2))
    assert bool(jnp.array_equal(out2, ref2))

    print("KERNEL_OK")
</pallas_src>

<mosaic_0001>
module attributes {stable_mosaic.version = 11 : i64} {
  func.func @_bcast_kernel(%arg0: i32, %arg1: i32, %arg2: memref<1x128xf32, #tpu.memory_space<vmem>>, %arg3: memref<2x128xf32, #tpu.memory_space<vmem>>) attributes {dimension_semantics = [#tpu.dimension_semantics<parallel>, #tpu.dimension_semantics<parallel>], iteration_bounds = array<i64: 2, 1>, scalar_prefetch = 0 : i64, scratch_operands = 0 : i64, tpu.core_type = #tpu.core_type<tc>, window_params = [{transform_indices = @transform_0, window_bounds = array<i64: 1, 128>}, {transform_indices = @transform_1, window_bounds = array<i64: 2, 128>}]} {
    %c0 = arith.constant 0 : index
    %c0_0 = arith.constant 0 : index
    %0 = vector.load %arg2[%c0, %c0_0] : memref<1x128xf32, #tpu.memory_space<vmem>>, vector<1x128xf32>
    %1 = vector.shape_cast %0 : vector<1x128xf32> to vector<1x128xf32>
    %2 = vector.broadcast %1 : vector<1x128xf32> to vector<2x128xf32>
    %c0_1 = arith.constant 0 : index
    %c0_2 = arith.constant 0 : index
    %3 = vector.load %arg3[%c0_1, %c0_2] : memref<2x128xf32, #tpu.memory_space<vmem>>, vector<2x128xf32>
    tpu.vector_store %arg3[%c0_1, %c0_2], %2 {strides = array<i32>} : memref<2x128xf32, #tpu.memory_space<vmem>>, vector<2x128xf32>,
    return
  }
  func.func @transform_0(%arg0: i32, %arg1: i32) -> (i32, i32) {
    %c0_i32 = arith.constant 0 : i32
    %c0_i32_0 = arith.constant 0 : i32
    return %c0_i32, %arg0 : i32, i32
  }
  func.func @transform_1(%arg0: i32, %arg1: i32) -> (i32, i32) {
    %c0_i32 = arith.constant 0 : i32
    return %arg1, %arg0 : i32, i32
  }
}

</mosaic_0001>

<bundles_post_ra>
// kernel: tpu_custom_call.1
= control target key start
LH: loop header
LB: loop body
LE: loop exit
PB: predicated region body
PF: predicated region fallthrough
CT: control target
= control target key end

     0   :  { %6 = vsyncpa [#allocation3], 0  ;;  %s617_s0 = inlined_call_operand.hbm [shape: f32[1,256], index: 0, kind: input, shape index: {}]   ;;  %s618_s1 = inlined_call_operand.hbm [shape: f32[2,256], index: 1, kind: output, shape index: {}]  }
   0x1   :  { %8 = vsyncpa [#allocation3 + $0x1], 0 }
   0x2   :  { %9 = vsyncpa [#allocation4], 0 }
   0x3   :  { %11 = vsyncpa [#allocation4 + $0x1], 0  ;;  %s444_s6 = smov 0   ;;  %s446_s7 = smov 0  }
   0x4   :  { %s448_s8 = smov 0   ;;  %s450_s9 = smov 0  }
   0x5   :  { %s452_s10 = smov 0   ;;  %s454_s11 = smov 0  }
   0x6 LB: > { %s244_s12 = sadd.s32 4294967295, %s430_s11   ;;  %s245_s13 = sadd.s32 4294967294, %s430_s11   ;;  %s430_s11 = sphi %s454_s11, %s17_s11   ;;  %s426_s10 = sphi %s452_s10, %s634_s10   ;;  %s422_s9 = sphi %s450_s9, %s633_s9   ;;  %s418_s8 = sphi %s448_s8, %s632_s8   ;;  %s414_s7 = sphi %s446_s7, %s631_s7   ;;  %s410_s6 = sphi %s444_s6, %s630_s6  }
   0x7   : > { %s29_s14 = sadd.s32 1, %s426_s10  ;;  %s36_s15 = sadd.s32 1, %s418_s8 }
   0x8   : > { %p31_p0 = scmp.ge.s32.totalorder %s29_s14, 2  ;;  %p43_p1 = scmp.ne.s32.totalorder %s418_s8, %s414_s7 }
   0x9   : > { %p44_p2 = scmp.eq.s32.totalorder %s430_s11, 0  ;;  %p49_p3 = scmp.ne.s32.totalorder %s414_s7, %s410_s6 }
   0xa   : > { %s636_s14 = smov (%p31_p0, %s29_s14), 0  ;;  %p50_p5 = scmp.eq.s32.totalorder %s244_s12, 0 }
   0xb   : > { %p485_p4 = por %p44_p2, %p43_p1  ;;  %s33_s17 = ssub.s32 %s426_s10, %s636_s14 }
   0xc   : > { %p75_p6 = scmp.eq.s32.totalorder %s244_s12, 1  ;;  %p34_p7 = scmp.eq.s32.totalorder %s33_s17, 0 }
   0xd   : > { %p491_p8 = por %p50_p5, %p49_p3  ;;  %p81_p10 = scmp.eq.s32.totalorder %s245_s13, 1 }
   0xe   : > { %p495_p9 = por %p75_p6, %p43_p1  ;;  %p268_p13 = scmp.lt.s32.totalorder %s430_s11, 2 }
   0xf   : > { %s500_s20 = scalar_select %p34_p7, %s418_s8, %s36_s15  }
  0x10   : > { %s622_s19 = scalar_select %p495_p9, 1, 0 }
  0x11   : > { %p502_p11 = por %p81_p10, %p49_p3  ;;  %s101_s22 = sand.u32 1, %s418_s8  }
  0x12   : > { %s248_s23 = sshll.u32 %s426_s10, 4  ;;  %s104_s24 = scalar_lea.vmem [#allocation2], %s101_s22 }
  0x13   : > { %s623_s21 = scalar_select %p502_p11, 1, 0 }
  0x14   : > { %s111_s25 = sshll.u32 %s104_s24, 4  ;;  %s513_s28 = scalar_lea.hbm %s617_s0, %s248_s23  ;;  %s515_s25 = int_to_ptr.vmem [resolvable:$true] %s111_s25 }
  0x15   : > { %p519_p0 = pnand %p268_p13, %p485_p4  ;;  %s102_s30 = scalar_lea.sflag [#allocation3], %s101_s22 }
  0x16   : > { %s318_s2 = scalar_lea.hbm %s513_s28, 16  ;;  %s323_s5 = scalar_lea.hbm %s617_s0, 32 }
  0x17   : > { %p319_p3 = scmp.ne.s32.totalorder %s513_s28, %s318_s2  ;;  %p320_p5 = pneg %p519_p0 }
  0x18   : > { %p324_p4 = scmp.lt.u32.totalorder %s513_s28, %s617_s0  ;;  %p325_p10 = scmp.lt.u32.totalorder %s323_s5, %s318_s2 }
  0x19   : > { %p321_p6 = pnand %p320_p5, %p319_p3  ;;  %p327_p12 = scmp.lt.u32.totalorder %s318_s2, %s513_s28 }
  0x1a   : > { %p326_p13 = por %p325_p10, %p324_p4 }
  0x1b   : > { %p322_p7 = pneg %p321_p6 }
  0x1c   : > { %p328_p1 = por %p327_p12, %p326_p13 }
  0x1e   : > { %p329_p2 = pnand %p328_p1, %p322_p7 }
  0x20   : > { %332 = shalt.err (!%p329_p2)
}
  0x21   : > { %s333_s15 = scalar_lea.vmem %s515_s25, 16  ;;  %s432_s16 = smov [#allocation2]  }
  0x22   : > { %p334_p3 = scmp.ne.s32.totalorder %s515_s25, %s333_s15  ;;  %s338_s17 = sshll.u32 %s432_s16, 4  ;;  %s339_s17 = int_to_ptr.vmem [resolvable:$false] %s338_s17 }
  0x23   : > { %s340_s22 = scalar_lea.vmem %s339_s17, 32  ;;  %p341_p9 = scmp.lt.s32.totalorder %s515_s25, %s339_s17 }
  0x24   : > { %p336_p6 = pnand %p334_p3, %p320_p5  ;;  %p342_p4 = scmp.lt.s32.totalorder %s340_s22, %s333_s15 }
  0x26   : > { %p337_p11 = pneg %p336_p6  ;;  %p343_p10 = por %p342_p4, %p341_p9 }
  0x28   : > { %p344_p12 = pnand %p343_p10, %p337_p11 }
  0x2a   : > { %347 = shalt.err (!%p344_p12)
}
  0x2b   : > { %263 = dma.hbm_to_vmem [thread:$0]  (!%p519_p0), %s513_s28, 16, %s515_s25, %s102_s30  }
  0x2c   : > { %p625_p1 = scmp.lt.s32.totalorder %s430_s11, 3  ;;  %p626_p2 = scmp.ge.s32.totalorder %s430_s11, 1 }
  0x2e   : > { %p117_p5 = pnand %p626_p2, %p625_p1 }
  0x2f   : > { %s555_s23 = sand.u32 (!%p117_p5), 1, %s414_s7  }
  0x30   : > { %120 = sbr.rel (%p117_p5) target bundleno = 82 (0x52), region = 24  ;;  %s123_s24 = scalar_lea.sflag (!%p117_p5), [#allocation3], %s555_s23 }
  0x31   : > { %s125_s26 = scalar_lea.vmem (!%p117_p5), [#allocation2], %s555_s23 }
  0x37   : > { %401 = dma.done.wait (%p491_p8), %s123_s24, 16  }
  0x38   : > { %403 = vsyncadd (%p491_p8), %s123_s24, 4294967280  ;;  %s250_s25 = sshll.u32 %s555_s23, 1  ;;  %s253_s29 = sshll.u32 %s422_s9, 5  ;;  %v251_v0 = vld [vmem:[%s125_s26] ss:$0 sm:$0xff] }
  0x39   : > { %s142_s27 = scalar_lea.vmem [#allocation5], %s250_s25  ;;  %s570_s3 = scalar_lea.hbm %s618_s1, %s253_s29 }
  0x3a   : > { %s167_s28 = sshll.u32 %s142_s27, 4  ;;  %150 = vst [vmem:[%s142_s27] sm:$0x3] %v251_v0  ;;  %s152_s18 = scalar_lea.sflag [#allocation4], %s555_s23  ;;  %s565_s28 = int_to_ptr.vmem [resolvable:$true] %s167_s28 }
  0x3b   : > { %s348_s4 = scalar_lea.vmem %s565_s28, 32  ;;  %p627_p9 = scmp.ne.s32.totalorder %s622_s19, 0 }
  0x3c   : > { %p349_p8 = scmp.ne.s32.totalorder %s565_s28, %s348_s4  ;;  %s433_s5 = smov [#allocation5]  }
  0x3d   : > { %s352_s9 = sshll.u32 %s433_s5, 4  ;;  %s353_s9 = int_to_ptr.vmem [resolvable:$false] %s352_s9 }
  0x3e   : > { %p350_p11 = pnand %p349_p8, %p627_p9  ;;  %s354_s12 = scalar_lea.vmem %s353_s9, 64 }
  0x3f   : > { %p355_p7 = scmp.lt.s32.totalorder %s565_s28, %s353_s9  ;;  %p356_p13 = scmp.lt.s32.totalorder %s354_s12, %s348_s4 }
  0x40   : > { %p351_p0 = pneg %p350_p11 }
  0x41   : > { %p357_p3 = por %p356_p13, %p355_p7 }
  0x43   : > { %p358_p6 = pnand %p357_p3, %p351_p0 }
  0x45   : > { %361 = shalt.err (!%p358_p6)
}
  0x46   : > { %s362_s13 = scalar_lea.hbm %s570_s3, 32  ;;  %s366_s17 = scalar_lea.hbm %s618_s1, 64 }
  0x47   : > { %p363_p4 = scmp.ne.s32.totalorder %s570_s3, %s362_s13  ;;  %p367_p1 = scmp.lt.u32.totalorder %s570_s3, %s618_s1 }
  0x48   : > { %p368_p2 = scmp.lt.u32.totalorder %s366_s17, %s362_s13  ;;  %p370_p8 = scmp.lt.u32.totalorder %s362_s13, %s570_s3 }
  0x49   : > { %p364_p10 = pnand %p363_p4, %p627_p9 }
  0x4a   : > { %p369_p5 = por %p368_p2, %p367_p1 }
  0x4b   : > { %p365_p12 = pneg %p364_p10 }
  0x4c   : > { %p371_p11 = por %p370_p8, %p369_p5 }
  0x4e   : > { %p372_p0 = pnand %p371_p11, %p365_p12 }
  0x50   : > { %375 = shalt.err (!%p372_p0)
}
  0x51   : > { %258 = dma.vmem_to_hbm [thread:$0]  (%p627_p9), %s565_s28, 32, %s570_s3, %s152_s18  }
  0x52 PF: > { %s179_s24 = sand.u32 1, %s410_s6   ;;  %p628_p7 = scmp.ne.s32.totalorder %s623_s21, 0 }
  0x53   : > { %p629_p13 = scmp.ge.s32.totalorder %s430_s11, 2  ;;  %s180_s26 = scalar_lea.sflag [#allocation4], %s179_s24 }
  0x55   : > { %p265_p3 = pnand %p629_p13, %p628_p7 }
  0x57   : > { %405 = dma.done.wait (!%p265_p3), %s180_s26, 32  }
  0x58   : > { %407 = vsyncadd (!%p265_p3), %s180_s26, 4294967264  ;;  %s17_s11 = sadd.s32 1, %s430_s11   ;;  %s630_s6 = smov %s414_s7 }
  0x59   : > { %p14_p6 = scmp.ge.s32.totalorder %s17_s11, 4   ;;  %s631_s7 = smov %s418_s8 }
  0x5a   : > { %s632_s8 = smov %s500_s20  ;;  %s633_s9 = smov %s426_s10 }
  0x5b   : > { %s634_s10 = smov %s636_s14  ;;  %16 = sbr.rel (!%p14_p6) target bundleno = 6 (0x6), region = 69 }
  0x62   :  { %185 = vsyncpa [#allocation3], 1 }
  0x63   :  { %187 = vsyncpa [#allocation3 + $0x1], 1 }
  0x64   :  { %188 = vsyncpa [#allocation4], 1 }
  0x65   :  { %190 = vsyncpa [#allocation4 + $0x1], 1 }

</bundles_post_ra>
